<compile_context>
chip_gen: v5e
topology: v5e:2x2
jax: 0.10.0
libtpu: 0.0.40
codegen_flags: <defaults>
</compile_context>

<pallas_src>
import functools
import math

import jax
import jax.numpy as jnp
from jax.experimental import pallas as pl
from jax.experimental.pallas import tpu as pltpu


def _round_up(a: int, b: int) -> int:
    return (a + b - 1) // b * b


def _physical_vmem_bytes() -> int:
    """Best-effort query of per-core VMEM; fall back to the v7x minimum."""
    try:
        info = pltpu.get_tpu_info()
        for attr in ("vmem_capacity_bytes", "vmem_size_bytes", "vmem_bytes"):
            v = getattr(info, attr, None)
            if isinstance(v, int) and v > 0:
                return v
    except Exception:
        pass
    return 64 * 1024 * 1024  # conservative: v7x per-TensorCore physical VMEM


def _pick_tile(size_aligned: int, candidates) -> int:
    """Pick the tile (from descending candidates) that minimizes padding;
    ties go to the largest tile. Falls back to the full (aligned) size."""
    valid = [c for c in candidates if c <= size_aligned]
    if not valid:
        return size_aligned
    return min(valid, key=lambda c: (_round_up(size_aligned, c) - size_aligned, -c))


def _ff_kernel(x_ref, w_in_ref, b_in_ref, w_out_ref, b_out_ref, o_ref,
               *acc_scratch, act_type):
    # x_ref:     (tm, d_model)   current M tile (resident across j)
    # w_in_ref:  (d_model, th)   j-th slab of W_in.T
    # b_in_ref:  (1, th)         j-th slab of b_in (f32)
    # w_out_ref: (th, d_model)   j-th slab of W_out.T
    # b_out_ref: (1, d_model)    full output bias (f32)
    # o_ref:     (tm, d_model)   output tile (resident across j)
    # acc_scratch: () for f32 outputs (accumulate into o_ref directly),
    #              (f32 VMEM (tm, d_model),) otherwise.
    acc_ref = acc_scratch[0] if acc_scratch else o_ref
    j = pl.program_id(1)

    @pl.when(j == 0)
    def _init():
        acc_ref[...] = jnp.zeros_like(acc_ref)

    # pre-activation slab: (tm, th) = x @ W_in.T[:, slab]   (MXU, f32 acc)
    pre = jnp.dot(x_ref[...], w_in_ref[...], preferred_element_type=jnp.float32)
    pre = pre + b_in_ref[...]

    if act_type == "ReLU":
        h = jnp.maximum(pre, 0.0)
    else:  # "GeLU": exact erf form, matching PyTorch F.gelu default.
        h = 0.5 * pre * (1.0 + jax.lax.erf(pre * (1.0 / math.sqrt(2.0))))

    # partial output: (tm, d_model) += h @ W_out.T[slab, :]
    acc_ref[...] += jnp.dot(h.astype(w_out_ref.dtype), w_out_ref[...],
                            preferred_element_type=jnp.float32)

    @pl.when(j == pl.num_programs(1) - 1)
    def _finalize():
        o_ref[...] = (acc_ref[...] + b_out_ref[...]).astype(o_ref.dtype)


def ff_forward(x, w_in, b_in, w_out, b_out, act_type="ReLU", *,
               compute_dtype=None, min_m_tiles=1):
    """x: (batch, seq, d_model); w_in: (d_mlp, d_model); b_in: (d_mlp,)
    w_out: (d_model, d_mlp); b_out: (d_model,). Returns (batch, seq, d_model)
    in x.dtype. `compute_dtype=jnp.bfloat16` enables bf16 matmuls with f32
    accumulation (recommended on all TPU generations); default keeps x.dtype.
    `min_m_tiles=2` helps v7x (two TensorCores) for small-M inputs."""
    assert act_type in ("ReLU", "GeLU")
    batch, seq, d_model = x.shape
    d_mlp, d_model_w = w_in.shape
    assert d_model_w == d_model
    assert b_in.shape == (d_mlp,)
    assert w_out.shape == (d_model, d_mlp)
    assert b_out.shape == (d_model,)

    out_dtype = jnp.dtype(x.dtype)
    compute_dtype = jnp.dtype(compute_dtype) if compute_dtype is not None else out_dtype
    in_isz = compute_dtype.itemsize
    out_isz = out_dtype.itemsize
    use_scratch_acc = out_dtype != jnp.dtype(jnp.float32)

    M = batch * seq
    M_al = _round_up(M, 8)
    H_al = _round_up(d_mlp, 128)

    # --- tile selection: minimize padding, then fit the VMEM budget ---
    tm = _pick_tile(M_al, (512, 384, 256, 128, 64, 32, 16, 8))
    th = _pick_tile(H_al, (512, 384, 256, 128))

    if min_m_tiles > 1:
        # Give the "parallel" M axis at least `min_m_tiles` tiles (v7x 2-TC).
        target = max(8, _round_up(-(-M_al // min_m_tiles), 8))
        tm = min(tm, target)

    phys_vmem = _physical_vmem_bytes()
    budget = int(phys_vmem * 0.6)  # double-buffered working-set budget

    def footprint(tm_, th_):
        f = 2 * tm_ * d_model * in_isz        # x tile (double buffered)
        f += 2 * d_model * th_ * in_isz       # W_in.T slab
        f += 2 * th_ * d_model * in_isz       # W_out.T slab
        f += 2 * (th_ + d_model) * 4          # bias slabs (f32)
        f += 2 * tm_ * d_model * out_isz      # output tile
        if use_scratch_acc:
            f += tm_ * d_model * 4            # f32 accumulator scratch
        f += tm_ * th_ * 4                    # pre/h intermediate (f32)
        return f

    while footprint(tm, th) > budget and (th > 128 or tm > 8):
        if th > 128:
            th -= 128            # stays a multiple of 128
        else:
            tm = max(8, tm // 2)  # stays a multiple of 8

    m_pad = _round_up(M_al, tm)
    h_pad = _round_up(H_al, th)

    # --- prepare operands (one-time layout / dtype plumbing in the wrapper) ---
    x2d = x.reshape(M, d_model).astype(compute_dtype)
    if m_pad != M:
        x2d = jnp.pad(x2d, ((0, m_pad - M), (0, 0)))

    # Contraction-on-RHS-sublane layout (A·B form) so the MXU feed needs no
    # per-tile XLU transposes.
    # TODO(synk): callers that own the parameters should store them pre-transposed.
    w_in_t = w_in.T.astype(compute_dtype)     # (d_model, d_mlp)
    w_out_t = w_out.T.astype(compute_dtype)   # (d_mlp, d_model)
    b_in_f = b_in.astype(jnp.float32)
    if h_pad != d_mlp:
        # Zero padding along d_mlp is exact: ReLU(0)=GeLU(0)=0 and the padded
        # W_out.T rows are zero, so padded hidden units contribute nothing.
        w_in_t = jnp.pad(w_in_t, ((0, 0), (0, h_pad - d_mlp)))
        w_out_t = jnp.pad(w_out_t, ((0, h_pad - d_mlp), (0, 0)))
        b_in_f = jnp.pad(b_in_f, ((0, h_pad - d_mlp),))

    b_in2 = b_in_f.reshape(1, h_pad)
    b_out2 = b_out.astype(jnp.float32).reshape(1, d_model)

    n_m_tiles = m_pad // tm
    grid = (n_m_tiles, h_pad // th)  # (parallel M tiles, d_mlp reduction tiles)

    cost = pl.CostEstimate(
        flops=4 * m_pad * d_model * h_pad,                      # two matmuls
        transcendentals=(m_pad * h_pad) if act_type == "GeLU" else 0,
        bytes_accessed=(m_pad * d_model * (in_isz + out_isz)    # x + out
                        + n_m_tiles * (2 * h_pad * d_model * in_isz   # weights re-streamed per M tile
                                       + (h_pad + d_model) * 4)),     # biases
    )

    scratch_shapes = ([pltpu.VMEM((tm, d_model), jnp.float32)]
                      if use_scratch_acc else [])

    vmem_limit = int(min(phys_vmem * 0.85,
                         max(32 * 1024 * 1024, 2 * footprint(tm, th))))

    out2d = pl.pallas_call(
        functools.partial(_ff_kernel, act_type=act_type),
        out_shape=jax.ShapeDtypeStruct((m_pad, d_model), out_dtype),
        grid_spec=pltpu.PrefetchScalarGridSpec(
            num_scalar_prefetch=0,
            grid=grid,
            in_specs=[
                # x tile: steps along M, resident across the d_mlp axis.
                pl.BlockSpec((tm, d_model), lambda i, j: (i, 0)),
                # W_in.T slab: steps along d_mlp only.
                pl.BlockSpec((d_model, th), lambda i, j: (0, j)),
                # b_in slab.
                pl.BlockSpec((1, th), lambda i, j: (0, j)),
                # W_out.T slab: steps along d_mlp only.
                pl.BlockSpec((th, d_model), lambda i, j: (j, 0)),
                # b_out: full, resident.
                pl.BlockSpec((1, d_model), lambda i, j: (0, 0)),
            ],
            out_specs=pl.BlockSpec((tm, d_model), lambda i, j: (i, 0)),
            scratch_shapes=scratch_shapes,
        ),
        compiler_params=pltpu.CompilerParams(
            dimension_semantics=("parallel", "arbitrary"),
            vmem_limit_bytes=vmem_limit,
        ),
        cost_estimate=cost,
    )(x2d, w_in_t, b_in2, w_out_t, b_out2)

    return out2d[:M].reshape(batch, seq, d_model)


if __name__ == "__main__":
    # Small shapes consistent with the module: x (batch, seq, d_model),
    # W_in (d_mlp, d_model), W_out (d_model, d_mlp).
    batch, seq, d_model, d_mlp = 2, 8, 32, 128

    key = jax.random.PRNGKey(0)
    kx, k1, k2, k3, k4 = jax.random.split(key, 5)

    x = jax.random.normal(kx, (batch, seq, d_model), dtype=jnp.float32)
    w_in = jax.random.normal(k1, (d_mlp, d_model), dtype=jnp.float32) / jnp.sqrt(
        jnp.float32(d_model))
    b_in = 0.1 * jax.random.normal(k2, (d_mlp,), dtype=jnp.float32)
    w_out = jax.random.normal(k3, (d_model, d_mlp), dtype=jnp.float32) / jnp.sqrt(
        jnp.float32(d_model))
    b_out = 0.1 * jax.random.normal(k4, (d_model,), dtype=jnp.float32)

    # Reference pre-activation (matches torch.einsum('md,bpd->bpm', W_in, x) + b_in)
    pre_ref = jnp.einsum("md,bpd->bpm", w_in, x) + b_in

    # --- ReLU path, f32 compute (exact PyTorch semantics) ---
    out_relu = jax.block_until_ready(
        ff_forward(x, w_in, b_in, w_out, b_out, act_type="ReLU"))
    ref_relu = jnp.einsum("dm,bpm->bpd", w_out, jnp.maximum(pre_ref, 0.0)) + b_out
    assert out_relu.shape == (batch, seq, d_model)
    assert jnp.allclose(out_relu, ref_relu, atol=1e-4, rtol=1e-4)

    # --- GeLU path, f32 compute (exact erf form, PyTorch F.gelu default) ---
    out_gelu = jax.block_until_ready(
        ff_forward(x, w_in, b_in, w_out, b_out, act_type="GeLU"))
    ref_gelu = jnp.einsum("dm,bpm->bpd", w_out,
                          jax.nn.gelu(pre_ref, approximate=False)) + b_out
    assert jnp.allclose(out_gelu, ref_gelu, atol=1e-4, rtol=1e-4)

    # --- bf16-compute / f32-accumulate fast path (perf-recommended) ---
    out_bf16 = jax.block_until_ready(
        ff_forward(x, w_in, b_in, w_out, b_out, act_type="ReLU",
                   compute_dtype=jnp.bfloat16))
    assert out_bf16.dtype == jnp.float32
    assert jnp.allclose(out_bf16, ref_relu, atol=1e-1, rtol=1e-1)

    # --- ragged shapes (padding on M and d_mlp) + min_m_tiles=2 (v7x 2-TC) ---
    b2, s2, dm2, dh2 = 2, 9, 32, 160
    k5, k6, k7, k8, k9 = jax.random.split(jax.random.PRNGKey(1), 5)
    x2 = jax.random.normal(k5, (b2, s2, dm2), dtype=jnp.float32)
    w_in2 = jax.random.normal(k6, (dh2, dm2), dtype=jnp.float32) / jnp.sqrt(
        jnp.float32(dm2))
    b_in2v = 0.1 * jax.random.normal(k7, (dh2,), dtype=jnp.float32)
    w_out2 = jax.random.normal(k8, (dm2, dh2), dtype=jnp.float32) / jnp.sqrt(
        jnp.float32(dm2))
    b_out2v = 0.1 * jax.random.normal(k9, (dm2,), dtype=jnp.float32)
    out2 = jax.block_until_ready(
        ff_forward(x2, w_in2, b_in2v, w_out2, b_out2v, act_type="ReLU",
                   min_m_tiles=2))
    pre2 = jnp.einsum("md,bpd->bpm", w_in2, x2) + b_in2v
    ref2 = jnp.einsum("dm,bpm->bpd", w_out2, jnp.maximum(pre2, 0.0)) + b_out2v
    assert jnp.allclose(out2, ref2, atol=1e-4, rtol=1e-4)

    print("KERNEL_OK")
</pallas_src>

<mosaic_0001>
module attributes {stable_mosaic.version = 11 : i64} {
  func.func @_ff_kernel(%arg0: i32, %arg1: i32, %arg2: memref<16x32xf32, #tpu.memory_space<vmem>>, %arg3: memref<32x128xf32, #tpu.memory_space<vmem>>, %arg4: memref<1x128xf32, #tpu.memory_space<vmem>>, %arg5: memref<128x32xf32, #tpu.memory_space<vmem>>, %arg6: memref<1x32xf32, #tpu.memory_space<vmem>>, %arg7: memref<16x32xf32, #tpu.memory_space<vmem>>) attributes {dimension_semantics = [#tpu.dimension_semantics<parallel>, #tpu.dimension_semantics<arbitrary>], iteration_bounds = array<i64: 1, 1>, scalar_prefetch = 0 : i64, scratch_operands = 0 : i64, tpu.core_type = #tpu.core_type<tc>, window_params = [{transform_indices = @transform_0, window_bounds = array<i64: 16, 32>}, {transform_indices = @transform_1, window_bounds = array<i64: 32, 128>}, {transform_indices = @transform_2, window_bounds = array<i64: 1, 128>}, {transform_indices = @transform_3, window_bounds = array<i64: 128, 32>}, {pipeline_mode = #tpu.pipeline_mode<synchronous>, transform_indices = @transform_4, window_bounds = array<i64: 1, 32>}, {transform_indices = @transform_5, window_bounds = array<i64: 16, 32>}]} {
    %c0_i32 = arith.constant 0 : i32
    %0 = arith.cmpi eq, %arg1, %c0_i32 : i32
    %1 = arith.extui %0 : i1 to i32
    %c0_i32_0 = arith.constant 0 : i32
    %2 = arith.cmpi ne, %1, %c0_i32_0 : i32
    scf.if %2 {
      %cst_16 = arith.constant 0.000000e+00 : f32
      %19 = vector.broadcast %cst_16 : f32 to vector<16x32xf32>
      %c0_17 = arith.constant 0 : index
      %c0_18 = arith.constant 0 : index
      %20 = vector.load %arg7[%c0_17, %c0_18] : memref<16x32xf32, #tpu.memory_space<vmem>>, vector<16x32xf32>
      tpu.vector_store %arg7[%c0_17, %c0_18], %19 {strides = array<i32>} : memref<16x32xf32, #tpu.memory_space<vmem>>, vector<16x32xf32>,
    } else {
    }
    %c0 = arith.constant 0 : index
    %c0_1 = arith.constant 0 : index
    %3 = vector.load %arg2[%c0, %c0_1] : memref<16x32xf32, #tpu.memory_space<vmem>>, vector<16x32xf32>
    %c0_2 = arith.constant 0 : index
    %c0_3 = arith.constant 0 : index
    %4 = vector.load %arg3[%c0_2, %c0_3] : memref<32x128xf32, #tpu.memory_space<vmem>>, vector<32x128xf32>
    %cst = arith.constant dense<0.000000e+00> : vector<16x128xf32>
    %5 = tpu.matmul %3, %4, %cst {dimension_numbers = #tpu.dot_dimension_numbers<[1], [0], [0], [1], [0, 0, 1, 1], [], []>} : vector<16x32xf32>, vector<32x128xf32>, vector<16x128xf32> -> vector<16x128xf32>
    %c0_4 = arith.constant 0 : index
    %c0_5 = arith.constant 0 : index
    %6 = vector.load %arg4[%c0_4, %c0_5] : memref<1x128xf32, #tpu.memory_space<vmem>>, vector<1x128xf32>
    %7 = vector.broadcast %6 : vector<1x128xf32> to vector<16x128xf32>
    %8 = arith.addf %5, %7 : vector<16x128xf32>
    %cst_6 = arith.constant 0.000000e+00 : f32
    %9 = vector.broadcast %cst_6 : f32 to vector<16x128xf32>
    %10 = arith.maximumf %8, %9 : vector<16x128xf32>
    %c0_7 = arith.constant 0 : index
    %c0_8 = arith.constant 0 : index
    %11 = vector.load %arg7[%c0_7, %c0_8] : memref<16x32xf32, #tpu.memory_space<vmem>>, vector<16x32xf32>
    %c0_9 = arith.constant 0 : index
    %c0_10 = arith.constant 0 : index
    %12 = vector.load %arg5[%c0_9, %c0_10] : memref<128x32xf32, #tpu.memory_space<vmem>>, vector<128x32xf32>
    %cst_11 = arith.constant dense<0.000000e+00> : vector<16x32xf32>
    %13 = tpu.matmul %10, %12, %cst_11 {dimension_numbers = #tpu.dot_dimension_numbers<[1], [0], [0], [1], [0, 0, 1, 1], [], []>} : vector<16x128xf32>, vector<128x32xf32>, vector<16x32xf32> -> vector<16x32xf32>
    %14 = arith.addf %11, %13 : vector<16x32xf32>
    %c0_12 = arith.constant 0 : index
    %c0_13 = arith.constant 0 : index
    %15 = vector.load %arg7[%c0_12, %c0_13] : memref<16x32xf32, #tpu.memory_space<vmem>>, vector<16x32xf32>
    tpu.vector_store %arg7[%c0_12, %c0_13], %14 {strides = array<i32>} : memref<16x32xf32, #tpu.memory_space<vmem>>, vector<16x32xf32>,
    %c0_i32_14 = arith.constant 0 : i32
    %16 = arith.cmpi eq, %arg1, %c0_i32_14 : i32
    %17 = arith.extui %16 : i1 to i32
    %c0_i32_15 = arith.constant 0 : i32
    %18 = arith.cmpi ne, %17, %c0_i32_15 : i32
    scf.if %18 {
      %c0_16 = arith.constant 0 : index
      %c0_17 = arith.constant 0 : index
      %19 = vector.load %arg7[%c0_16, %c0_17] : memref<16x32xf32, #tpu.memory_space<vmem>>, vector<16x32xf32>
      %c0_18 = arith.constant 0 : index
      %c0_19 = arith.constant 0 : index
      %20 = vector.load %arg6[%c0_18, %c0_19] : memref<1x32xf32, #tpu.memory_space<vmem>>, vector<1x32xf32>
      %21 = vector.broadcast %20 : vector<1x32xf32> to vector<16x32xf32>
      %22 = arith.addf %19, %21 : vector<16x32xf32>
      %c0_20 = arith.constant 0 : index
      %c0_21 = arith.constant 0 : index
      %23 = vector.load %arg7[%c0_20, %c0_21] : memref<16x32xf32, #tpu.memory_space<vmem>>, vector<16x32xf32>
      tpu.vector_store %arg7[%c0_20, %c0_21], %22 {strides = array<i32>} : memref<16x32xf32, #tpu.memory_space<vmem>>, vector<16x32xf32>,
    } else {
    }
    return
  }
  func.func @transform_0(%arg0: i32, %arg1: i32) -> (i32, i32) {
    %c0_i32 = arith.constant 0 : i32
    %c0_i32_0 = arith.constant 0 : i32
    return %arg0, %c0_i32 : i32, i32
  }
  func.func @transform_1(%arg0: i32, %arg1: i32) -> (i32, i32) {
    %c0_i32 = arith.constant 0 : i32
    %c0_i32_0 = arith.constant 0 : i32
    return %c0_i32, %arg1 : i32, i32
  }
  func.func @transform_2(%arg0: i32, %arg1: i32) -> (i32, i32) {
    %c0_i32 = arith.constant 0 : i32
    %c0_i32_0 = arith.constant 0 : i32
    return %c0_i32, %arg1 : i32, i32
  }
  func.func @transform_3(%arg0: i32, %arg1: i32) -> (i32, i32) {
    %c0_i32 = arith.constant 0 : i32
    %c0_i32_0 = arith.constant 0 : i32
    return %arg1, %c0_i32 : i32, i32
  }
  func.func @transform_4(%arg0: i32, %arg1: i32) -> (i32, i32) {
    %c0_i32 = arith.constant 0 : i32
    %c0_i32_0 = arith.constant 0 : i32
    %c0_i32_1 = arith.constant 0 : i32
    return %c0_i32, %c0_i32_0 : i32, i32
  }
  func.func @transform_5(%arg0: i32, %arg1: i32) -> (i32, i32) {
    %c0_i32 = arith.constant 0 : i32
    %c0_i32_0 = arith.constant 0 : i32
    return %arg0, %c0_i32 : i32, i32
  }
}

</mosaic_0001>

<bundles_post_ra>
// kernel: tpu_custom_call.1
= control target key start
LH: loop header
LB: loop body
LE: loop exit
PB: predicated region body
PF: predicated region fallthrough
CT: control target
= control target key end

     0   :  { %vm25_vm0 = vcmask 261120   ;;  %s313_s0 = inlined_call_operand.vmem [shape: f32[16,32], index: 0, kind: input, shape index: {}]   ;;  %s314_s1 = inlined_call_operand.vmem [shape: f32[32,128], index: 1, kind: input, shape index: {}]   ;;  %s315_s2 = inlined_call_operand.vmem [shape: f32[1,128], index: 2, kind: input, shape index: {}]   ;;  %s316_s3 = inlined_call_operand.vmem [shape: f32[128,32], index: 3, kind: input, shape index: {}]   ;;  %s317_s4 = inlined_call_operand.vmem [shape: f32[1,32], index: 4, kind: input, shape index: {}]   ;;  %s318_s5 = inlined_call_operand.hbm [shape: f32[16,32], index: 5, kind: output, shape index: {}]  }
   0x1   :  { %v33_v0 = vld [vmem:[%s314_s1 + $0x18] sm:$0xff]  ;;  %v32_v1 = vld [vmem:[%s314_s1 + $0x10] sm:$0xff]  ;;  %v31_v2 = vld [vmem:[%s314_s1 + $0x8] sm:$0xff] }
   0x2   :  { %57 = vmatpush.msra.mxu0 %v33_v0  ;;  %v87_v3 = vld [vmem:[%s316_s3 + $0x78] sm:$0xff]  ;;  %v86_v4 = vld [vmem:[%s316_s3 + $0x70] sm:$0xff]  ;;  %v30_v5 = vld [vmem:[%s314_s1] sm:$0xff] }
   0x3   :  { %88 = vmatpush.msra.mxu1 %v87_v3  ;;  %v85_v6 = vld [vmem:[%s316_s3 + $0x68] sm:$0xff]  ;;  %148 = vmatpush.msra.mxu2 %v87_v3  ;;  %v28_v7 = vld [vmem:[%s313_s0] sm:$0xff] }
   0x4   :  { %58 = vmatpush.msra.mxu0 %v32_v1  ;;  %v84_v8 = vld [vmem:[%s316_s3 + $0x60] sm:$0xff] }
   0x5   :  { %89 = vmatpush.msra.mxu1 %v86_v4  ;;  %149 = vmatpush.msra.mxu2 %v86_v4 }
   0x6   :  { %59 = vmatpush.msra.mxu0 %v31_v2 }
   0x7   :  { %90 = vmatpush.msra.mxu1 %v85_v6 }
   0x8   :  { %60 = vmatpush.msra.mxu0 %v30_v5 }
   0x9   :  { %10 = vsyncpa [#allocation3], 0  ;;  %146 = vmatmul.msk.f32.vlgmr.msra.gmra.mxu0 %vm25_vm0, %v28_v7  ;;  %v83_v9 = vld [vmem:[%s316_s3 + $0x58] sm:$0xff]  ;;  %150 = vmatpush.msra.mxu2 %v85_v6  ;;  %v82_v10 = vld [vmem:[%s316_s3 + $0x50] sm:$0xff]  ;;  %v196_v22 = vmov 0.0   ;;  %s134_s15 = sshll.u32 %s318_s5, 4  ;;  %s135_s15 = int_to_ptr.hbm [resolvable:$true] %s134_s15 }
   0xa   :  { %91 = vmatpush.msra.mxu1 %v84_v8  ;;  %v81_v11 = vld [vmem:[%s316_s3 + $0x48] sm:$0xff]  ;;  %v80_v13 = vld [vmem:[%s316_s3 + $0x40] sm:$0xff]  ;;  %v79_v14 = vld [vmem:[%s316_s3 + $0x38] sm:$0xff]  ;;  %26 = vst.msk [vmem:[#allocation2] sm:$0xff] %vm25_vm0, %v196_v22  ;;  %s199_s16 = smov 8  }
   0xb   :  { %151 = vmatpush.msra.mxu2 %v84_v8  ;;  %v29_v12 = vld [vmem:[%s313_s0 + $0x8] sm:$0xff]  ;;  %v78_v15 = vld [vmem:[%s316_s3 + $0x30] sm:$0xff]  ;;  %v76_v17 = vld [vmem:[%s316_s3 + $0x20] sm:$0xff]  ;;  %27 = vst.msk [vmem:[#allocation2 + $0x8] sm:$0xff] %vm25_vm0, %v196_v22 }
   0xc   :  { %92 = vmatpush.msra.mxu1 %v83_v9  ;;  %v77_v16 = vld [vmem:[%s316_s3 + $0x28] sm:$0xff]  ;;  %v75_v18 = vld [vmem:[%s316_s3 + $0x18] sm:$0xff]  ;;  %v74_v19 = vld [vmem:[%s316_s3 + $0x10] sm:$0xff] }
   0xd   :  { %152 = vmatpush.msra.mxu2 %v83_v9  ;;  %v73_v20 = vld [vmem:[%s316_s3 + $0x8] sm:$0xff]  ;;  %v72_v21 = vld [vmem:[%s316_s3] sm:$0xff] }
   0xe   :  { %93 = vmatpush.msra.mxu1 %v82_v10  ;;  %v168_v23 = vld [vmem:[%s315_s2] ss:$0 sm:$0xff]  ;;  %s197_s2 = smov [#allocation2]  }
   0xf   :  { %153 = vmatpush.msra.mxu2 %v82_v10  ;;  %v169_v33 = vld [vmem:[%s317_s4] ss:$0 sm:$0xff]  ;;  %s132_s12 = sshll.u32 %s197_s2, 4  ;;  %s198_s4 = smov 128   ;;  %s133_s12 = int_to_ptr.vmem [resolvable:$true] %s132_s12 }
  0x10   :  { %94 = vmatpush.msra.mxu1 %v81_v11 }
  0x11   :  { %147 = vmatmul.msk.f32.gmra.mxu0 %vm25_vm0, %v29_v12  ;;  %154 = vmatpush.msra.mxu2 %v81_v11  ;;  %v70_v30 = vld [vmem:[#allocation2] sm:$0xff] }
  0x12   :  { %95 = vmatpush.msra.mxu1 %v80_v13  ;;  %v71_v36 = vld [vmem:[#allocation2 + $0x8] sm:$0xff] }
  0x13   :  { %155 = vmatpush.msra.mxu2 %v80_v13 }
  0x14   :  { %96 = vmatpush.msra.mxu1 %v79_v14 }
  0x15   :  { %156 = vmatpush.msra.mxu2 %v79_v14 }
  0x16   :  { %97 = vmatpush.msra.mxu1 %v78_v15 }
  0x17   :  { %157 = vmatpush.msra.mxu2 %v78_v15 }
  0x18   :  { %98 = vmatpush.msra.mxu1 %v77_v16 }
  0x19   :  { %158 = vmatpush.msra.mxu2 %v77_v16 }
  0x1a   :  { %99 = vmatpush.msra.mxu1 %v76_v17 }
  0x1b   :  { %159 = vmatpush.msra.mxu2 %v76_v17 }
  0x1c   :  { %100 = vmatpush.msra.mxu1 %v75_v18 }
  0x1d   :  { %160 = vmatpush.msra.mxu2 %v75_v18 }
  0x1e   :  { %101 = vmatpush.msra.mxu1 %v74_v19 }
  0x1f   :  { %161 = vmatpush.msra.mxu2 %v74_v19 }
  0x20   :  { %102 = vmatpush.msra.mxu1 %v73_v20 }
  0x21   :  { %162 = vmatpush.msra.mxu2 %v73_v20 }
  0x22   :  { %103 = vmatpush.msra.mxu1 %v72_v21 }
  0x23   :  { %163 = vmatpush.msra.mxu2 %v72_v21 }
  0x86   :  { %v62_v24 = vpop.f32.mrf.mxu0 }
  0x87   :  { %v63_v25 = vadd.f32 %v168_v23, %v62_v24 }
  0x89   :  { %v68_v26 = vmax.f32 %v63_v25, 0.0 }
  0x8b   :  { %104 = vmatmul.f32.vlgmr.msra.gmra.mxu1 %v68_v26 }
  0x8e   :  { %v65_v27 = vpop.f32.mrf.mxu0 }
  0x8f   :  { %v66_v28 = vadd.f32 %v168_v23, %v65_v27 }
  0x91   :  { %v69_v29 = vmax.f32 %v66_v28, 0.0 }
  0x93   :  { %107 = vmatmul.f32.vlgmr.msra.gmra.mxu2 %v69_v29 }
 0x108   :  { %v105_v31 = vpop.f32.mrf.mxu1 }
 0x109   :  { %v111_v32 = vadd.f32 %v105_v31, %v70_v30 }
 0x10b   :  { %113 = vst.msk [vmem:[#allocation2] sm:$0xff] %vm25_vm0, %v111_v32 }
 0x112   :  { %v118_v34 = vld [vmem:[#allocation2] sm:$0xff] }
 0x113   :  { %v124_v35 = vadd.f32 %v169_v33, %v118_v34 }
 0x115   :  { %126 = vst.msk [vmem:[#allocation2] sm:$0xff] %vm25_vm0, %v124_v35 }
 0x116   :  { %v108_v37 = vpop.f32.mrf.mxu2 }
 0x117   :  { %v112_v38 = vadd.f32 %v108_v37, %v71_v36 }
 0x119   :  { %114 = vst.msk [vmem:[#allocation2 + $0x8] sm:$0xff] %vm25_vm0, %v112_v38 }
 0x120   :  { %v119_v39 = vld [vmem:[#allocation2 + $0x8] sm:$0xff] }
 0x121   :  { %v125_v40 = vadd.f32 %v169_v33, %v119_v39 }
 0x123   :  { %127 = vst.msk [vmem:[#allocation2 + $0x8] sm:$0xff] %vm25_vm0, %v125_v40 }
 0x124   :  { %140 = dma.vmem_to_hbm [thread:$0]  %s133_s12, 256, %s135_s15, [#allocation3], %s198_s4, %s198_s4, %s199_s16  }
 0x125   :  { %194 = dma.done.wait [#allocation3], 256  }
 0x126   :  { %195 = vsyncadd [#allocation3], 4294967040 }
 0x127   :  { %145 = vsyncpa [#allocation3], 1 }

</bundles_post_ra>
